<compile_context>
chip_gen: v5e
topology: v5e:2x2
jax: 0.10.0
libtpu: 0.0.40
codegen_flags: <defaults>
</compile_context>

<pallas_src>
import jax
import jax.numpy as jnp
from jax import lax
from jax.experimental import pallas as pl
from jax.experimental.pallas import tpu as pltpu

REFS = (1, 2, 3, 5, 8, 13, 21, 34, 55, 89)   # compile-time constants
NUM_EMB = len(REFS) + 1                      # 11, as in nn.Embedding(len(refs)+1, D)


def distance_kernel(dist_ref, emb_ref, out_ref):
    """dist_ref: VMEM (TB, 1) int32   -- raw distances for this tile
       emb_ref : VMEM (NUM_EMB, D)    -- full embedding table (resident)
       out_ref : VMEM (TB, D)         -- gathered embedding rows
    """
    tb = dist_ref.shape[0]
    num_emb = emb_ref.shape[0]

    d = dist_ref[...]                                        # (TB, 1) int32
    # cnt = number of refs <= distance; REFS baked as immediates (VPU compares).
    cnt = jnp.zeros_like(d)
    for r in REFS:
        cnt = cnt + (d >= jnp.int32(r)).astype(jnp.int32)
    # idx = largest i with distance >= refs[i]; clamp so distance < refs[0]
    # maps to bucket 0 instead of an out-of-bounds read.
    idx = jnp.maximum(cnt - jnp.int32(1), jnp.int32(0))      # (TB, 1)

    # One-hot row selector -> gather on the MXU (lane-dense (TB, D) result).
    col = lax.broadcasted_iota(jnp.int32, (tb, num_emb), 1)  # (TB, NUM_EMB)
    onehot = (col == idx).astype(emb_ref.dtype)              # (TB, NUM_EMB)
    out_ref[...] = jnp.dot(
        onehot, emb_ref[...], preferred_element_type=jnp.float32
    ).astype(out_ref.dtype)
    # TODO(synk): nn.Dropout omitted (identity in eval mode; training-mode RNG
    # masking would use pltpu.prng_seed / pltpu.stateful_bernoulli).


def distance_layer(distances, emb_table, *, tile_b=8):
    """Batched DistanceLayer forward: distances (B,) int32 -> (B, D) embeddings."""
    distances = jnp.asarray(distances, jnp.int32).reshape(-1)
    B = distances.shape[0]
    num_emb, D = emb_table.shape

    # Pad batch to a multiple of the tile (padding value 1 -> bucket 0, discarded).
    Bp = ((B + tile_b - 1) // tile_b) * tile_b
    if Bp != B:
        distances = jnp.pad(distances, (0, Bp - B), constant_values=1)
    dist2d = distances.reshape(Bp, 1)

    out = pl.pallas_call(
        distance_kernel,
        out_shape=jax.ShapeDtypeStruct((Bp, D), emb_table.dtype),
        grid_spec=pltpu.PrefetchScalarGridSpec(
            num_scalar_prefetch=0,
            grid=(Bp // tile_b,),
            in_specs=[
                # (TB, 1) distances per step; last dim equals full array dim.
                pl.BlockSpec((tile_b, 1), lambda i: (i, 0)),
                # Full embedding table; same block every step -> DMA'd once.
                pl.BlockSpec((num_emb, D), lambda i: (0, 0)),
            ],
            out_specs=pl.BlockSpec((tile_b, D), lambda i: (i, 0)),
        ),
        compiler_params=pltpu.CompilerParams(
            dimension_semantics=("parallel",)   # v7x: shard batch over both TCs
        ),
    )(dist2d, emb_table)
    return out[:B]


if __name__ == "__main__":
    distance_dim = 128   # lane-dense output tiles (TB=8, D=128)
    key = jax.random.PRNGKey(0)
    # Deterministic "checkpoint": N(0,1) init like nn.Embedding default.
    emb_table = jax.random.normal(key, (NUM_EMB, distance_dim), jnp.float32)

    # Batch of distances hitting every bucket + boundaries.
    distances = jnp.asarray(
        [1, 2, 3, 4, 5, 8, 13, 20, 21, 27, 34, 55, 88, 89, 100, 1000],
        dtype=jnp.int32,
    )

    out = distance_layer(distances, emb_table)
    out = jax.block_until_ready(out)

    # Pure-JAX reference of the same semantics.
    refs = jnp.asarray(REFS, jnp.int32)
    ref_idx = jnp.maximum(jnp.sum(distances[:, None] >= refs[None, :], axis=1) - 1, 0)
    ref_out = emb_table[ref_idx]
    assert out.shape == (distances.shape[0], distance_dim)
    assert jnp.allclose(out, ref_out), "mismatch vs reference embedding rows"

    # Single-distance path (matches PyTorch forward's (1, D) output shape).
    single = distance_layer(jnp.asarray([27], jnp.int32), emb_table)
    single = jax.block_until_ready(single)
    assert single.shape == (1, distance_dim)
    assert jnp.allclose(single[0], emb_table[6]), "single-lookup mismatch (27 -> bucket 6)"

    print("KERNEL_OK")
</pallas_src>

<mosaic_0001>
module attributes {stable_mosaic.version = 11 : i64} {
  func.func @distance_kernel(%arg0: i32, %arg1: memref<8x1xi32, #tpu.memory_space<vmem>>, %arg2: memref<11x128xf32, #tpu.memory_space<vmem>>, %arg3: memref<8x128xf32, #tpu.memory_space<vmem>>) attributes {dimension_semantics = [#tpu.dimension_semantics<parallel>], iteration_bounds = array<i64: 2>, scalar_prefetch = 0 : i64, scratch_operands = 0 : i64, tpu.core_type = #tpu.core_type<tc>, window_params = [{transform_indices = @transform_0, window_bounds = array<i64: 8, 1>}, {pipeline_mode = #tpu.pipeline_mode<synchronous>, transform_indices = @transform_1, window_bounds = array<i64: 11, 128>}, {transform_indices = @transform_2, window_bounds = array<i64: 8, 128>}]} {
    %c0 = arith.constant 0 : index
    %c0_0 = arith.constant 0 : index
    %0 = vector.load %arg1[%c0, %c0_0] : memref<8x1xi32, #tpu.memory_space<vmem>>, vector<8x1xi32>
    %c0_i32 = arith.constant 0 : i32
    %1 = vector.broadcast %c0_i32 : i32 to vector<8x1xi32>
    %c1_i32 = arith.constant 1 : i32
    %2 = vector.broadcast %c1_i32 : i32 to vector<8x1xi32>
    %3 = arith.cmpi sge, %0, %2 : vector<8x1xi32>
    %4 = arith.extui %3 : vector<8x1xi1> to vector<8x1xi32>
    %5 = arith.addi %1, %4 : vector<8x1xi32>
    %c2_i32 = arith.constant 2 : i32
    %6 = vector.broadcast %c2_i32 : i32 to vector<8x1xi32>
    %7 = arith.cmpi sge, %0, %6 : vector<8x1xi32>
    %8 = arith.extui %7 : vector<8x1xi1> to vector<8x1xi32>
    %9 = arith.addi %5, %8 : vector<8x1xi32>
    %c3_i32 = arith.constant 3 : i32
    %10 = vector.broadcast %c3_i32 : i32 to vector<8x1xi32>
    %11 = arith.cmpi sge, %0, %10 : vector<8x1xi32>
    %12 = arith.extui %11 : vector<8x1xi1> to vector<8x1xi32>
    %13 = arith.addi %9, %12 : vector<8x1xi32>
    %c5_i32 = arith.constant 5 : i32
    %14 = vector.broadcast %c5_i32 : i32 to vector<8x1xi32>
    %15 = arith.cmpi sge, %0, %14 : vector<8x1xi32>
    %16 = arith.extui %15 : vector<8x1xi1> to vector<8x1xi32>
    %17 = arith.addi %13, %16 : vector<8x1xi32>
    %c8_i32 = arith.constant 8 : i32
    %18 = vector.broadcast %c8_i32 : i32 to vector<8x1xi32>
    %19 = arith.cmpi sge, %0, %18 : vector<8x1xi32>
    %20 = arith.extui %19 : vector<8x1xi1> to vector<8x1xi32>
    %21 = arith.addi %17, %20 : vector<8x1xi32>
    %c13_i32 = arith.constant 13 : i32
    %22 = vector.broadcast %c13_i32 : i32 to vector<8x1xi32>
    %23 = arith.cmpi sge, %0, %22 : vector<8x1xi32>
    %24 = arith.extui %23 : vector<8x1xi1> to vector<8x1xi32>
    %25 = arith.addi %21, %24 : vector<8x1xi32>
    %c21_i32 = arith.constant 21 : i32
    %26 = vector.broadcast %c21_i32 : i32 to vector<8x1xi32>
    %27 = arith.cmpi sge, %0, %26 : vector<8x1xi32>
    %28 = arith.extui %27 : vector<8x1xi1> to vector<8x1xi32>
    %29 = arith.addi %25, %28 : vector<8x1xi32>
    %c34_i32 = arith.constant 34 : i32
    %30 = vector.broadcast %c34_i32 : i32 to vector<8x1xi32>
    %31 = arith.cmpi sge, %0, %30 : vector<8x1xi32>
    %32 = arith.extui %31 : vector<8x1xi1> to vector<8x1xi32>
    %33 = arith.addi %29, %32 : vector<8x1xi32>
    %c55_i32 = arith.constant 55 : i32
    %34 = vector.broadcast %c55_i32 : i32 to vector<8x1xi32>
    %35 = arith.cmpi sge, %0, %34 : vector<8x1xi32>
    %36 = arith.extui %35 : vector<8x1xi1> to vector<8x1xi32>
    %37 = arith.addi %33, %36 : vector<8x1xi32>
    %c89_i32 = arith.constant 89 : i32
    %38 = vector.broadcast %c89_i32 : i32 to vector<8x1xi32>
    %39 = arith.cmpi sge, %0, %38 : vector<8x1xi32>
    %40 = arith.extui %39 : vector<8x1xi1> to vector<8x1xi32>
    %41 = arith.addi %37, %40 : vector<8x1xi32>
    %c1_i32_1 = arith.constant 1 : i32
    %42 = vector.broadcast %c1_i32_1 : i32 to vector<8x1xi32>
    %43 = arith.subi %41, %42 : vector<8x1xi32>
    %c0_i32_2 = arith.constant 0 : i32
    %44 = vector.broadcast %c0_i32_2 : i32 to vector<8x1xi32>
    %45 = arith.maxsi %43, %44 : vector<8x1xi32>
    %46 = tpu.iota {dimensions = array<i32: 1>} : vector<8x11xi32>
    %47 = vector.broadcast %45 : vector<8x1xi32> to vector<8x11xi32>
    %48 = arith.cmpi eq, %46, %47 : vector<8x11xi32>
    %49 = arith.extui %48 : vector<8x11xi1> to vector<8x11xi32>
    %50 = arith.sitofp %49 : vector<8x11xi32> to vector<8x11xf32>
    %c0_3 = arith.constant 0 : index
    %c0_4 = arith.constant 0 : index
    %51 = vector.load %arg2[%c0_3, %c0_4] : memref<11x128xf32, #tpu.memory_space<vmem>>, vector<11x128xf32>
    %cst = arith.constant dense<0.000000e+00> : vector<8x128xf32>
    %52 = tpu.matmul %50, %51, %cst {dimension_numbers = #tpu.dot_dimension_numbers<[1], [0], [0], [1], [0, 0, 1, 1], [], []>} : vector<8x11xf32>, vector<11x128xf32>, vector<8x128xf32> -> vector<8x128xf32>
    %c0_5 = arith.constant 0 : index
    %c0_6 = arith.constant 0 : index
    %53 = vector.load %arg3[%c0_5, %c0_6] : memref<8x128xf32, #tpu.memory_space<vmem>>, vector<8x128xf32>
    tpu.vector_store %arg3[%c0_5, %c0_6], %52 {strides = array<i32>} : memref<8x128xf32, #tpu.memory_space<vmem>>, vector<8x128xf32>,
    return
  }
  func.func @transform_0(%arg0: i32) -> (i32, i32) {
    %c0_i32 = arith.constant 0 : i32
    %c0_i32_0 = arith.constant 0 : i32
    return %arg0, %c0_i32 : i32, i32
  }
  func.func @transform_1(%arg0: i32) -> (i32, i32) {
    %c0_i32 = arith.constant 0 : i32
    %c0_i32_0 = arith.constant 0 : i32
    %c0_i32_1 = arith.constant 0 : i32
    return %c0_i32, %c0_i32_0 : i32, i32
  }
  func.func @transform_2(%arg0: i32) -> (i32, i32) {
    %c0_i32 = arith.constant 0 : i32
    %c0_i32_0 = arith.constant 0 : i32
    return %arg0, %c0_i32 : i32, i32
  }
}

</mosaic_0001>

<bundles_post_ra>
// kernel: tpu_custom_call.1
= control target key start
LH: loop header
LB: loop body
LE: loop exit
PB: predicated region body
PF: predicated region fallthrough
CT: control target
= control target key end

     0   :  { %7 = vsyncpa [#allocation3], 0  ;;  %s514_s0 = inlined_call_operand.vmem [shape: s32[16,1], index: 0, kind: input, shape index: {}]   ;;  %s515_s1 = inlined_call_operand.vmem [shape: f32[11,128], index: 1, kind: input, shape index: {}]   ;;  %s516_s2 = inlined_call_operand.hbm [shape: f32[16,128], index: 2, kind: output, shape index: {}]  }
   0x1   :  { %9 = vsyncpa [#allocation3 + $0x1], 0  ;;  %s423_s9 = smov 0   ;;  %s425_s10 = smov 0  }
   0x2   :  { %s427_s11 = smov 0   ;;  %s429_s12 = smov 0  }
   0x3 LB: > { %s444_s13 = sadd.s32 4294967295, %s404_s12   ;;  %s286_s14 = sadd.s32 4294967294, %s404_s12   ;;  %s404_s12 = sphi %s429_s12, %s522_s12   ;;  %s400_s11 = sphi %s427_s11, %s521_s11   ;;  %s396_s10 = sphi %s425_s10, %s520_s10   ;;  %s392_s9 = sphi %s423_s9, %s519_s9  }
   0x4   : > { %s448_s15 = sadd.s32 1, %s404_s12   ;;  %s69_s16 = sadd.s32 1, %s400_s11 }
   0x5   : > { %s66_s17 = ssub.s32 %s404_s12, %s448_s15  ;;  %p79_p0 = scmp.ne.s32.totalorder %s400_s11, %s396_s10 }
   0x6   : > { %p67_p1 = scmp.eq.s32.totalorder %s66_s17, 0  ;;  %p80_p2 = scmp.eq.s32.totalorder %s444_s13, 1 }
   0x7   : > { %p85_p3 = scmp.ne.s32.totalorder %s396_s10, %s392_s9  ;;  %p86_p4 = scmp.eq.s32.totalorder %s286_s14, 1 }
   0x8   : > { %s459_s18 = scalar_select %p67_p1, %s400_s11, %s69_s16  }
   0x9   : > { %p461_p5 = por %p80_p2, %p79_p0  ;;  %p465_p6 = por %p86_p4, %p85_p3 }
   0xa   : > { %p289_p7 = scmp.ge.s32.totalorder %s404_s12, 1  ;;  %p114_p8 = scmp.lt.s32.totalorder %s404_s12, 3 }
   0xc   : > { %p115_p9 = pnand %p289_p7, %p114_p8 }
   0xd   : > { %p135_p10 = scmp.lt.s32.totalorder (!%p115_p9), %s444_s13, 1  ;;  %s132_s30 = sand.u32 (!%p115_p9), 1, %s396_s10  }
   0xe   : > { %118 = sbr.rel (%p115_p9) target bundleno = 294 (0x126), region = 28  ;;  %s290_s3 = sshll.u32 (!%p115_p9), %s132_s30, 3 }
   0xf   : > { %s297_s4 = sshll.u32 (!%p115_p9), %s444_s13, 3  ;;  %s134_s8 = scalar_lea.vmem (!%p115_p9), [#allocation2], %s290_s3 }
  0x10   : > { %s222_s7 = scalar_lea.hbm (!%p115_p9), %s516_s2, %s297_s4  ;;  %s224_s14 = sshll.u32 (!%p115_p9), %s134_s8, 4  ;;  %s225_s14 = int_to_ptr.vmem [resolvable:$true] %s224_s14 }
  0x11   : > { %s226_s16 = sshll.u32 (!%p115_p9), %s222_s7, 4  ;;  %s212_s17 = scalar_lea.sflag (!%p115_p9), [#allocation3], %s132_s30  ;;  %s227_s16 = int_to_ptr.hbm [resolvable:$true] %s226_s16 }
  0x12   : > { %s356_s21 = sshra.s32 (!%p115_p9), %s227_s16, 4  ;;  %s357_s21 = int_to_ptr.hbm [resolvable:$true] %s356_s21 }
  0x13   : > { %v181_v0 = vld [vmem:[%s515_s1 + $0x8] sm:$0x7]  ;;  %vm186_vm0 = vcmask 1042432   ;;  %v406_v1 = vmov 0   ;;  %s136_s23 = scalar_select %p135_p10, %s444_s13, 1  ;;  %v180_v24 = vld [vmem:[%s515_s1] sm:$0xff]  ;;  %v172_v25 = vlaneseq }
  0x14   : > { %341 = vset.pattern.permute.xlu0 %v406_v1  ;;  %294 = vmatpush.msk.msra.mxu0 %vm186_vm0, %v181_v0  ;;  %vm182_vm12 = vcmask 89088   ;;  %v407_v28 = vmov 0.0   ;;  %s358_s22 = scalar_lea.hbm %s357_s21, 8  ;;  %p363_p0 = scmp.lt.s32.totalorder %s357_s21, %s516_s2 }
  0x15   : > { %s291_s24 = sshll.u32 %s136_s23, 3  ;;  %v173_v26 = vand.u32 127, %v172_v25  ;;  %p359_p11 = scmp.ne.s32.totalorder %s357_s21, %s358_s22 }
  0x16   : > { %s138_s27 = scalar_lea.vmem %s514_s0, %s291_s24  ;;  %205 = vmatpush.msra.mxu0 %v180_v24  ;;  %s362_s24 = scalar_lea.hbm %s516_s2, 16 }
  0x17   : > { %v139_v2 = vld [vmem:[%s138_s27] sm:$0xff]  ;;  %p360_p12 = pnand %p359_p11, %p461_p5  ;;  %p364_p1 = scmp.lt.s32.totalorder %s362_s24, %s358_s22 }
  0x18   : > { %vm140_vm1 = vcmp.ge.s32.totalorder %v139_v2, 1  ;;  %vm142_vm2 = vcmp.ge.s32.totalorder %v139_v2, 2  ;;  %vm145_vm3 = vcmp.ge.s32.totalorder %v139_v2, 3  ;;  %vm148_vm4 = vcmp.ge.s32.totalorder %v139_v2, 5 }
  0x19   : > { %v141_v3 = vsel %vm140_vm1, 1, %v406_v1  ;;  %v143_v4 = vsel %vm142_vm2, 1, %v406_v1  ;;  %v146_v5 = vsel %vm145_vm3, 1, %v406_v1  ;;  %vm151_vm5 = vcmp.ge.s32.totalorder %v139_v2, 8  ;;  %p361_p13 = pneg %p360_p12  ;;  %p365_p2 = por %p364_p1, %p363_p0 }
  0x1a   : > { %v144_v6 = vadd.s32 %v143_v4, %v141_v3  ;;  %v149_v7 = vsel %vm148_vm4, 1, %v406_v1  ;;  %vm154_vm6 = vcmp.ge.s32.totalorder %v139_v2, 13  ;;  %v152_v9 = vsel %vm151_vm5, 1, %v406_v1 }
  0x1b   : > { %vm157_vm7 = vcmp.ge.s32.totalorder %v139_v2, 21  ;;  %v155_v11 = vsel %vm154_vm6, 1, %v406_v1  ;;  %vm160_vm8 = vcmp.ge.s32.totalorder %v139_v2, 34  ;;  %vm163_vm9 = vcmp.ge.s32.totalorder %v139_v2, 55  ;;  %p366_p3 = pnand %p365_p2, %p361_p13 }
  0x1c   : > { %v147_v8 = vadd.s32 %v146_v5, %v144_v6  ;;  %v158_v13 = vsel %vm157_vm7, 1, %v406_v1  ;;  %v161_v15 = vsel %vm160_vm8, 1, %v406_v1  ;;  %vm166_vm10 = vcmp.ge.s32.totalorder %v139_v2, 89 }
  0x1d   : > { %v164_v17 = vsel %vm163_vm9, 1, %v406_v1  ;;  %v167_v19 = vsel %vm166_vm10, 1, %v406_v1 }
  0x1e   : > { %v150_v10 = vadd.s32 %v149_v7, %v147_v8 }
  0x20   : > { %v153_v12 = vadd.s32 %v152_v9, %v150_v10 }
  0x22   : > { %v156_v14 = vadd.s32 %v155_v11, %v153_v12 }
  0x24   : > { %v159_v16 = vadd.s32 %v158_v13, %v156_v14 }
  0x26   : > { %v162_v18 = vadd.s32 %v161_v15, %v159_v16 }
  0x28   : > { %v165_v20 = vadd.s32 %v164_v17, %v162_v18 }
  0x2a   : > { %v168_v21 = vadd.s32 %v167_v19, %v165_v20 }
  0x2c   : > { %v292_v22 = vadd.s32 4294967295, %v168_v21 }
  0x2e   : > { %vm170_vm11 = vcmp.gt.s32.totalorder %v292_v22, 0 }
  0x2f   : > { %v171_v23 = vsel %vm170_vm11, %v292_v22, 0 }
  0x30   : > { %175 = vperm.xlu0 %341, %v171_v23  }
  0xa2   : > { %v176_v27 = vpop.permute.xlu0 %175 }
  0xa3   : > { %vm177_vm13 = vcmp.eq.s32.totalorder %v173_v26, %v176_v27 }
  0xa4   : > { %v293_v29 = vsel %vm177_vm13, 1.0, %v407_v28 }
  0xa5   : > { %295 = vmatmul.msk.f32.vlgmr.msra.gmra.mxu0 %vm182_vm12, %v293_v29 }
 0x122   : > { %v207_v30 = vpop.f32.mrf.mxu0 }
 0x123   : > { %210 = vst [vmem:[%s134_s8] sm:$0xff] %v207_v30 }
 0x124   : > { %369 = shalt.err (!%p366_p3)
}
 0x125   : > { %300 = dma.vmem_to_hbm [thread:$0]  (%p461_p5), %s225_s14, 128, %s227_s16, %s212_s17  }
 0x126 PF: > { %p306_p4 = scmp.ge.s32.totalorder %s404_s12, 2  ;;  %s238_s27 = sand.u32 1, %s392_s9  }
 0x127   : > { %s239_s28 = scalar_lea.sflag [#allocation3], %s238_s27 }
 0x128   : > { %p303_p7 = pnand %p306_p4, %p465_p6 }
 0x12a   : > { %p304_p8 = pneg %p303_p7 }
 0x12c   : > { %387 = dma.done.wait (%p304_p8), %s239_s28, 128  }
 0x12d   : > { %389 = vsyncadd (%p304_p8), %s239_s28, 4294967168  ;;  %p12_p9 = scmp.ge.s32.totalorder %s448_s15, 4   ;;  %s519_s9 = smov %s396_s10 }
 0x12e   : > { %s520_s10 = smov %s400_s11  ;;  %s521_s11 = smov %s459_s18 }
 0x12f   : > { %s522_s12 = smov %s448_s15  ;;  %14 = sbr.rel (!%p12_p9) target bundleno = 3 (0x3), region = 63 }
 0x134   :  { %245 = vsyncpa [#allocation3], 1 }
 0x135   :  { %247 = vsyncpa [#allocation3 + $0x1], 1 }

</bundles_post_ra>
